<compile_context>
chip_gen: v7x
topology: tpu7x:2x2x1
jax: 0.10.0
libtpu: 0.0.40
codegen_flags: <defaults>
</compile_context>

<pallas_src>
import functools

import jax
import jax.numpy as jnp
from jax.experimental import pallas as pl
from jax.experimental.pallas import tpu as pltpu

_LANES = 128
_SUB_ROWS = 512          # rows per in-kernel sub-chunk (bounds live ranges)
_MAX_BLOCK_ROWS = 4096   # 4096 * 128 * 4B = 2 MiB per f32 input block
_NCORES = 2              # megacore split on v7x; harmless serial pass on 1-TC chips


def _vae_loss_kernel(recon_ref, x_ref, mu_ref, logvar_ref, out_ref, acc_ref, *,
                     use_bce: bool, beta: float, tiles_per_core: int,
                     block_rows: int, sub_rows: int, full_rows: int,
                     lane_rem: int):
    c = pl.program_id(0)          # core index (parallel axis)
    i = pl.program_id(1)          # row-block index within this core
    blk = c * tiles_per_core + i  # logical (unclamped) global block index

    @pl.when(i == 0)
    def _init():
        acc_ref[...] = jnp.zeros_like(acc_ref)

    n_sub = block_rows // sub_rows
    block_row0 = blk * block_rows

    # Hoisted, loop-invariant iotas (JAX does not CSE broadcast_in_dim).
    row_iota = jax.lax.broadcasted_iota(jnp.int32, (sub_rows, _LANES), 0)
    if lane_rem:
        lane_iota = jax.lax.broadcasted_iota(jnp.int32, (sub_rows, _LANES), 1)

    def process_chunk(s):
        r0 = pl.multiple_of(s * sub_rows, sub_rows)
        recon = recon_ref[pl.ds(r0, sub_rows), :].astype(jnp.float32)
        x = x_ref[pl.ds(r0, sub_rows), :].astype(jnp.float32)

        if use_bce:
            # F.binary_cross_entropy clamps log terms at -100 (PyTorch
            # semantics); log1p(-r) avoids cancellation for r near 1.
            # Folded: -(x*log_r + (1-x)*log_1mr) == -(x*(log_r-log_1mr)+log_1mr)
            log_r = jnp.maximum(jnp.log(recon), -100.0)
            log_1mr = jnp.maximum(jnp.log1p(-recon), -100.0)
            per_elem = -(x * (log_r - log_1mr) + log_1mr)
        else:
            diff = recon - x
            per_elem = diff * diff

        # Validity mask: drops the ragged tail of the last real block, the
        # phantom block of the second core (clamped index_map), and the
        # n % 128 lane remainder.  Select, so NaN/Inf garbage is discarded.
        grow = block_row0 + r0 + row_iota
        if lane_rem:
            mask = (grow < full_rows) | ((grow == full_rows) &
                                         (lane_iota < lane_rem))
        else:
            mask = grow < full_rows
        per_elem = jnp.where(mask, per_elem, 0.0)

        # VPU-only partial reduction into the (8, 128) accumulator.
        acc_ref[...] = acc_ref[...] + jnp.sum(
            per_elem.reshape(-1, 8, _LANES), axis=0)

    if n_sub == 1:
        process_chunk(0)
    else:
        def body(s, carry):
            process_chunk(s)
            return carry
        jax.lax.fori_loop(0, n_sub, body, 0)

    @pl.when(i == tiles_per_core - 1)
    def _finalize():
        partial = jnp.sum(acc_ref[...])           # single cross-lane reduce
        mu = mu_ref[...].astype(jnp.float32)
        lv = logvar_ref[...].astype(jnp.float32)
        kld_terms = 1.0 + lv - mu * mu - jnp.exp(lv)
        kld = -0.5 * (jnp.sum(kld_terms) / jnp.float32(kld_terms.size))
        # Only core 0 adds the (tiny) KL contribution.
        out_ref[0, 0] = partial + jnp.where(
            c == 0, jnp.float32(beta) * kld, jnp.float32(0.0))


def vae_loss(recon_x, x, mu, logvar, *, use_bce=True, beta=1.0):
    """Returns a scalar f32 loss matching VAELoss.forward."""
    assert recon_x.shape == x.shape
    assert mu.shape == logvar.shape

    n = recon_x.size
    rows = -(-n // _LANES)          # ceil
    full_rows = n // _LANES         # number of completely-filled rows
    lane_rem = n % _LANES

    if rows <= _SUB_ROWS:
        block_rows = max(8, ((rows + 7) // 8) * 8)
        sub_rows = block_rows
    else:
        block_rows = min(_MAX_BLOCK_ROWS,
                         ((rows + _SUB_ROWS - 1) // _SUB_ROWS) * _SUB_ROWS)
        sub_rows = _SUB_ROWS

    num_tiles = -(-rows // block_rows)
    ncores = _NCORES if num_tiles >= 2 else 1
    tiles_per_core = -(-num_tiles // ncores)

    recon_flat = recon_x.reshape(-1)
    x_flat = x.reshape(-1)
    pad = rows * _LANES - n
    if pad:
        # Only the n % 128 != 0 tail (<=127 elems) needs a pad; values are
        # masked in-kernel so zeros are fine.
        recon_flat = jnp.concatenate(
            [recon_flat, jnp.zeros((pad,), recon_flat.dtype)])
        x_flat = jnp.concatenate(
            [x_flat, jnp.zeros((pad,), x_flat.dtype)])

    recon2d = recon_flat.reshape(rows, _LANES)
    x2d = x_flat.reshape(rows, _LANES)
    mu2d = mu.reshape(1, -1)
    logvar2d = logvar.reshape(1, -1)

    kernel = functools.partial(
        _vae_loss_kernel, use_bce=use_bce, beta=float(beta),
        tiles_per_core=tiles_per_core, block_rows=block_rows,
        sub_rows=sub_rows, full_rows=full_rows, lane_rem=lane_rem)

    def data_map(c, i):
        # Clamp phantom blocks (last core, odd tile count) to the last valid
        # block; their contribution is fully masked out in-kernel.
        return (jnp.minimum(c * tiles_per_core + i, num_tiles - 1), 0)

    partials = pl.pallas_call(
        kernel,
        out_shape=jax.ShapeDtypeStruct((ncores, 1), jnp.float32),
        grid_spec=pltpu.PrefetchScalarGridSpec(
            num_scalar_prefetch=0,
            grid=(ncores, tiles_per_core),
            in_specs=[
                pl.BlockSpec((block_rows, _LANES), data_map),       # recon
                pl.BlockSpec((block_rows, _LANES), data_map),       # x
                pl.BlockSpec(mu2d.shape, lambda c, i: (0, 0)),      # mu (resident)
                pl.BlockSpec(logvar2d.shape, lambda c, i: (0, 0)),  # logvar (resident)
            ],
            out_specs=pl.BlockSpec((1, 1), lambda c, i: (c, 0),
                                   memory_space=pltpu.SMEM),
            scratch_shapes=[pltpu.VMEM((8, _LANES), jnp.float32)],
        ),
        compiler_params=pltpu.CompilerParams(
            dimension_semantics=("parallel", "arbitrary"),
            vmem_limit_bytes=32 * 1024 * 1024,
        ),
    )(recon2d, x2d, mu2d, logvar2d)
    return jnp.sum(partials)


def _reference(recon_x, x, mu, logvar, use_bce=True, beta=1.0):
    recon_x = recon_x.astype(jnp.float32)
    x = x.astype(jnp.float32)
    if use_bce:
        log_r = jnp.maximum(jnp.log(recon_x), -100.0)
        log_1mr = jnp.maximum(jnp.log1p(-recon_x), -100.0)
        recon_loss = jnp.sum(-(x * log_r + (1.0 - x) * log_1mr))
    else:
        recon_loss = jnp.sum((recon_x - x) ** 2)
    mu = mu.astype(jnp.float32)
    logvar = logvar.astype(jnp.float32)
    kld = -0.5 * jnp.mean(1.0 + logvar - mu ** 2 - jnp.exp(logvar))
    return recon_loss + beta * kld


if __name__ == "__main__":
    key = jax.random.PRNGKey(0)
    k1, k2, k3, k4 = jax.random.split(key, 4)

    B, C, H, W = 2, 4, 16, 16
    LATENT = 32

    recon_x = jax.nn.sigmoid(jax.random.normal(k1, (B, C, H, W), jnp.float32))
    x = jax.random.uniform(k2, (B, C, H, W), jnp.float32)
    mu = jax.random.normal(k3, (B, LATENT), jnp.float32)
    logvar = 0.1 * jax.random.normal(k4, (B, LATENT), jnp.float32)

    bce_fn = jax.jit(functools.partial(vae_loss, use_bce=True, beta=1.0))
    mse_fn = jax.jit(functools.partial(vae_loss, use_bce=False, beta=0.5))

    # --- primary test: small NCHW tensors, BCE path --------------------------
    loss = bce_fn(recon_x, x, mu, logvar)
    jax.block_until_ready(loss)
    ref = _reference(recon_x, x, mu, logvar, use_bce=True, beta=1.0)
    assert jnp.allclose(loss, ref, rtol=1e-5, atol=1e-3), (loss, ref)

    # --- lane-remainder test: size not a multiple of 128, MSE path -----------
    recon_p = jax.nn.sigmoid(jax.random.normal(k1, (2, 3, 15, 17), jnp.float32))
    x_p = jax.random.uniform(k2, (2, 3, 15, 17), jnp.float32)
    loss_p = mse_fn(recon_p, x_p, mu, logvar)
    jax.block_until_ready(loss_p)
    ref_p = _reference(recon_p, x_p, mu, logvar, use_bce=False, beta=0.5)
    assert jnp.allclose(loss_p, ref_p, rtol=1e-5, atol=1e-3), (loss_p, ref_p)

    # --- multi-tile / two-core test (even tile count) -------------------------
    recon_b = jax.nn.sigmoid(jax.random.normal(k3, (2, 4, 512, 512), jnp.float32))
    x_b = jax.random.uniform(k4, (2, 4, 512, 512), jnp.float32)
    loss_b = bce_fn(recon_b, x_b, mu, logvar)
    jax.block_until_ready(loss_b)
    ref_b = _reference(recon_b, x_b, mu, logvar, use_bce=True, beta=1.0)
    assert jnp.allclose(loss_b, ref_b, rtol=1e-4, atol=1.0), (loss_b, ref_b)

    # --- odd tile count: exercises ragged last block + phantom block ----------
    recon_o = jax.nn.sigmoid(jax.random.normal(k1, (2, 4, 384, 384), jnp.float32))
    x_o = jax.random.uniform(k2, (2, 4, 384, 384), jnp.float32)
    loss_o = bce_fn(recon_o, x_o, mu, logvar)
    jax.block_until_ready(loss_o)
    ref_o = _reference(recon_o, x_o, mu, logvar, use_bce=True, beta=1.0)
    assert jnp.allclose(loss_o, ref_o, rtol=1e-4, atol=1.0), (loss_o, ref_o)

    # --- bf16 streaming test (inputs stay bf16 into the kernel) ---------------
    recon_h = recon_x.astype(jnp.bfloat16)
    x_h = x.astype(jnp.bfloat16)
    loss_h = bce_fn(recon_h, x_h, mu, logvar)
    jax.block_until_ready(loss_h)
    ref_h = _reference(recon_h, x_h, mu, logvar, use_bce=True, beta=1.0)
    assert jnp.allclose(loss_h, ref_h, rtol=1e-3, atol=1e-2), (loss_h, ref_h)

    print("KERNEL_OK")
</pallas_src>

<mosaic_0001>
module attributes {stable_mosaic.version = 11 : i64} {
  func.func @_vae_loss_kernel(%arg0: i32, %arg1: i32, %arg2: memref<16x128xf32, #tpu.memory_space<vmem>>, %arg3: memref<16x128xf32, #tpu.memory_space<vmem>>, %arg4: memref<1x64xf32, #tpu.memory_space<vmem>>, %arg5: memref<1x64xf32, #tpu.memory_space<vmem>>, %arg6: memref<1x1xf32, #tpu.memory_space<smem>>, %arg7: memref<8x128xf32, #tpu.memory_space<vmem>>) attributes {dimension_semantics = [#tpu.dimension_semantics<parallel>, #tpu.dimension_semantics<arbitrary>], iteration_bounds = array<i64: 1, 1>, scalar_prefetch = 0 : i64, scratch_operands = 1 : i64, tpu.core_type = #tpu.core_type<tc>, window_params = [{transform_indices = @transform_0, window_bounds = array<i64: 16, 128>}, {transform_indices = @transform_1, window_bounds = array<i64: 16, 128>}, {pipeline_mode = #tpu.pipeline_mode<synchronous>, transform_indices = @transform_2, window_bounds = array<i64: 1, 64>}, {pipeline_mode = #tpu.pipeline_mode<synchronous>, transform_indices = @transform_3, window_bounds = array<i64: 1, 64>}, {transform_indices = @transform_4, window_bounds = array<i64: 1, 1>}]} {
    %c1_i32 = arith.constant 1 : i32
    %0 = arith.muli %arg0, %c1_i32 : i32
    %1 = arith.addi %0, %arg1 : i32
    %c0_i32 = arith.constant 0 : i32
    %2 = arith.cmpi eq, %arg1, %c0_i32 : i32
    %3 = arith.extui %2 : i1 to i32
    %c0_i32_0 = arith.constant 0 : i32
    %4 = arith.cmpi ne, %3, %c0_i32_0 : i32
    scf.if %4 {
      %cst_15 = arith.constant 0.000000e+00 : f32
      %40 = vector.broadcast %cst_15 : f32 to vector<8x128xf32>
      %c0_16 = arith.constant 0 : index
      %c0_17 = arith.constant 0 : index
      %41 = vector.load %arg7[%c0_16, %c0_17] : memref<8x128xf32, #tpu.memory_space<vmem>>, vector<8x128xf32>
      tpu.vector_store %arg7[%c0_16, %c0_17], %40 {strides = array<i32>} : memref<8x128xf32, #tpu.memory_space<vmem>>, vector<8x128xf32>,
    } else {
    }
    %c16_i32 = arith.constant 16 : i32
    %5 = arith.muli %1, %c16_i32 : i32
    %6 = tpu.iota {dimensions = array<i32: 0>} : vector<16x128xi32>
    %c0_i32_1 = arith.constant 0 : i32
    %7 = tpu.assume_multiple %c0_i32_1, 16 : i32
    %8 = arith.index_cast %7 : i32 to index
    %c0 = arith.constant 0 : index
    %9 = vector.load %arg2[%8, %c0] : memref<16x128xf32, #tpu.memory_space<vmem>>, vector<16x128xf32>
    %10 = arith.index_cast %7 : i32 to index
    %c0_2 = arith.constant 0 : index
    %11 = vector.load %arg3[%10, %c0_2] : memref<16x128xf32, #tpu.memory_space<vmem>>, vector<16x128xf32>
    %12 = math.log %9 : vector<16x128xf32>
    %cst = arith.constant -1.000000e+02 : f32
    %13 = vector.broadcast %cst : f32 to vector<16x128xf32>
    %14 = arith.maximumf %12, %13 : vector<16x128xf32>
    %cst_3 = arith.constant 0.000000e+00 : f32
    %15 = vector.broadcast %cst_3 : f32 to vector<16x128xf32>
    %16 = arith.subf %15, %9 : vector<16x128xf32>
    %17 = math.log1p %16 : vector<16x128xf32>
    %cst_4 = arith.constant -1.000000e+02 : f32
    %18 = vector.broadcast %cst_4 : f32 to vector<16x128xf32>
    %19 = arith.maximumf %17, %18 : vector<16x128xf32>
    %20 = arith.subf %14, %19 : vector<16x128xf32>
    %21 = arith.mulf %11, %20 : vector<16x128xf32>
    %22 = arith.addf %21, %19 : vector<16x128xf32>
    %cst_5 = arith.constant 0.000000e+00 : f32
    %23 = vector.broadcast %cst_5 : f32 to vector<16x128xf32>
    %24 = arith.subf %23, %22 : vector<16x128xf32>
    %25 = arith.addi %5, %7 : i32
    %26 = vector.broadcast %25 : i32 to vector<16x128xi32>
    %27 = arith.addi %26, %6 : vector<16x128xi32>
    %c16_i32_6 = arith.constant 16 : i32
    %28 = vector.broadcast %c16_i32_6 : i32 to vector<16x128xi32>
    %29 = arith.cmpi slt, %27, %28 : vector<16x128xi32>
    %cst_7 = arith.constant 0.000000e+00 : f32
    %30 = vector.broadcast %cst_7 : f32 to vector<16x128xf32>
    %31 = arith.select %29, %24, %30 : vector<16x128xi1>, vector<16x128xf32>
    %c0_8 = arith.constant 0 : index
    %c0_9 = arith.constant 0 : index
    %32 = vector.load %arg7[%c0_8, %c0_9] : memref<8x128xf32, #tpu.memory_space<vmem>>, vector<8x128xf32>
    %33 = vector.shape_cast %31 : vector<16x128xf32> to vector<2x8x128xf32>
    %cst_10 = arith.constant dense<0.000000e+00> : vector<8x128xf32>
    %34 = vector.multi_reduction <add>, %33, %cst_10 [0] : vector<2x8x128xf32> to vector<8x128xf32>
    %35 = arith.addf %32, %34 : vector<8x128xf32>
    %c0_11 = arith.constant 0 : index
    %c0_12 = arith.constant 0 : index
    %36 = vector.load %arg7[%c0_11, %c0_12] : memref<8x128xf32, #tpu.memory_space<vmem>>, vector<8x128xf32>
    tpu.vector_store %arg7[%c0_11, %c0_12], %35 {strides = array<i32>} : memref<8x128xf32, #tpu.memory_space<vmem>>, vector<8x128xf32>,
    %c0_i32_13 = arith.constant 0 : i32
    %37 = arith.cmpi eq, %arg1, %c0_i32_13 : i32
    %38 = arith.extui %37 : i1 to i32
    %c0_i32_14 = arith.constant 0 : i32
    %39 = arith.cmpi ne, %38, %c0_i32_14 : i32
    scf.if %39 {
      %c0_15 = arith.constant 0 : index
      %c0_16 = arith.constant 0 : index
      %40 = vector.load %arg7[%c0_15, %c0_16] : memref<8x128xf32, #tpu.memory_space<vmem>>, vector<8x128xf32>
      %41 = vector.shape_cast %40 : vector<8x128xf32> to vector<1x8x128xf32>
      %cst_17 = arith.constant dense<0.000000e+00> : vector<1xf32>
      %42 = vector.multi_reduction <add>, %41, %cst_17 [1, 2] : vector<1x8x128xf32> to vector<1xf32>
      %43 = vector.shape_cast %42 : vector<1xf32> to vector<1x1x1xf32>
      %44 = vector.extract %43[0, 0, 0] : f32 from vector<1x1x1xf32>
      %c0_18 = arith.constant 0 : index
      %c0_19 = arith.constant 0 : index
      %45 = vector.load %arg4[%c0_18, %c0_19] : memref<1x64xf32, #tpu.memory_space<vmem>>, vector<1x64xf32>
      %c0_20 = arith.constant 0 : index
      %c0_21 = arith.constant 0 : index
      %46 = vector.load %arg5[%c0_20, %c0_21] : memref<1x64xf32, #tpu.memory_space<vmem>>, vector<1x64xf32>
      %cst_22 = arith.constant 1.000000e+00 : f32
      %47 = vector.broadcast %cst_22 : f32 to vector<1x64xf32>
      %48 = arith.addf %47, %46 : vector<1x64xf32>
      %49 = arith.mulf %45, %45 : vector<1x64xf32>
      %50 = arith.subf %48, %49 : vector<1x64xf32>
      %51 = math.exp %46 : vector<1x64xf32>
      %52 = arith.subf %50, %51 : vector<1x64xf32>
      %53 = vector.shape_cast %52 : vector<1x64xf32> to vector<1x1x64xf32>
      %cst_23 = arith.constant dense<0.000000e+00> : vector<1xf32>
      %54 = vector.multi_reduction <add>, %53, %cst_23 [1, 2] : vector<1x1x64xf32> to vector<1xf32>
      %55 = vector.shape_cast %54 : vector<1xf32> to vector<1x1x1xf32>
      %56 = vector.extract %55[0, 0, 0] : f32 from vector<1x1x1xf32>
      %cst_24 = arith.constant 6.400000e+01 : f32
      %57 = arith.divf %56, %cst_24 : f32
      %cst_25 = arith.constant -5.000000e-01 : f32
      %58 = arith.mulf %cst_25, %57 : f32
      %c0_i32_26 = arith.constant 0 : i32
      %59 = arith.cmpi eq, %arg0, %c0_i32_26 : i32
      %cst_27 = arith.constant 1.000000e+00 : f32
      %60 = arith.mulf %cst_27, %58 : f32
      %cst_28 = arith.constant 0.000000e+00 : f32
      %61 = arith.select %59, %60, %cst_28 : f32
      %62 = arith.addf %44, %61 : f32
      %c0_29 = arith.constant 0 : index
      %c0_30 = arith.constant 0 : index
      %63 = memref.load %arg6[%c0_29, %c0_30] : memref<1x1xf32, #tpu.memory_space<smem>>
      memref.store %62, %arg6[%c0_29, %c0_30] : memref<1x1xf32, #tpu.memory_space<smem>>
    } else {
    }
    return
  }
  func.func @transform_0(%arg0: i32, %arg1: i32) -> (i32, i32) {
    %c1_i32 = arith.constant 1 : i32
    %0 = arith.muli %arg0, %c1_i32 : i32
    %1 = arith.addi %0, %arg1 : i32
    %c0_i32 = arith.constant 0 : i32
    %2 = arith.minsi %1, %c0_i32 : i32
    %c0_i32_0 = arith.constant 0 : i32
    %c0_i32_1 = arith.constant 0 : i32
    return %2, %c0_i32_0 : i32, i32
  }
  func.func @transform_1(%arg0: i32, %arg1: i32) -> (i32, i32) {
    %c1_i32 = arith.constant 1 : i32
    %0 = arith.muli %arg0, %c1_i32 : i32
    %1 = arith.addi %0, %arg1 : i32
    %c0_i32 = arith.constant 0 : i32
    %2 = arith.minsi %1, %c0_i32 : i32
    %c0_i32_0 = arith.constant 0 : i32
    %c0_i32_1 = arith.constant 0 : i32
    return %2, %c0_i32_0 : i32, i32
  }
  func.func @transform_2(%arg0: i32, %arg1: i32) -> (i32, i32) {
    %c0_i32 = arith.constant 0 : i32
    %c0_i32_0 = arith.constant 0 : i32
    %c0_i32_1 = arith.constant 0 : i32
    return %c0_i32, %c0_i32_0 : i32, i32
  }
  func.func @transform_3(%arg0: i32, %arg1: i32) -> (i32, i32) {
    %c0_i32 = arith.constant 0 : i32
    %c0_i32_0 = arith.constant 0 : i32
    %c0_i32_1 = arith.constant 0 : i32
    return %c0_i32, %c0_i32_0 : i32, i32
  }
  func.func @transform_4(%arg0: i32, %arg1: i32) -> (i32, i32) {
    %c0_i32 = arith.constant 0 : i32
    %c0_i32_0 = arith.constant 0 : i32
    return %arg0, %c0_i32 : i32, i32
  }
}

</mosaic_0001>

<bundles_post_ra>
// kernel: vae_loss.1
= control target key start
LH: loop header
LB: loop body
LE: loop exit
PB: predicated region body
PF: predicated region fallthrough
CT: control target
= control target key end

     0   :  { %s293_s0 = inlined_call_operand.vmem [shape: f32[16,128], index: 0, kind: input, shape index: {}]   ;;  %s294_s1 = inlined_call_operand.vmem [shape: f32[16,128], index: 1, kind: input, shape index: {}]   ;;  %s295_s2 = inlined_call_operand.vmem [shape: f32[1,64], index: 2, kind: input, shape index: {}]   ;;  %s296_s3 = inlined_call_operand.vmem [shape: f32[1,64], index: 3, kind: input, shape index: {}]   ;;  %s297_s4 = inlined_call_operand.hbm [shape: f32[1,1], index: 4, kind: output, shape index: {}]  }
   0x1   :  { %v92_v0 = vld [vmem:[%s293_s0] sm:$0xff]  ;;  %v93_v1 = vld [vmem:[%s293_s0 + $0x8] sm:$0xff] }
   0x2   :  { %215 = vlog2.f32 %v92_v0  ;;  %v102_v2 = vsub.f32 0.0, %v92_v0  ;;  %v103_v3 = vsub.f32 0.0, %v93_v1 }
   0x3   :  { %217 = vlog2.f32 %v93_v1 }
   0x4   :  { %9 = vsyncpa [#allocation4], 0  ;;  %v104_v4 = vadd.f32 1.0, %v102_v2  ;;  %v113_v5 = vadd.f32 1.0, %v103_v3  ;;  %v107_v6 = vmul.f32 -0.5, %v102_v2  ;;  %v116_v7 = vmul.f32 -0.5, %v103_v3 }
   0x5   :  { %v158_v8 = vld [vmem:[%s296_s3] sm:$0x1]  ;;  %v110_v11 = vand.u32 2147483647, %v102_v2  ;;  %v119_v14 = vand.u32 2147483647, %v103_v3 }
   0x6   :  { %219 = vlog2.f32 %v104_v4  ;;  %v108_v9 = vadd.f32 1.0, %v107_v6  ;;  %v117_v12 = vadd.f32 1.0, %v116_v7  ;;  %v162_v15 = vmul.f32 1.442695, %v158_v8  ;;  %v157_v27 = vld [vmem:[%s295_s2] sm:$0x1] }
   0x7   :  { %221 = vlog2.f32 %v113_v5  ;;  %vm111_vm0 = vcmp.lt.f32.partialorder %v110_v11, 0.0004427343  ;;  %vm120_vm1 = vcmp.lt.f32.partialorder %v119_v14, 0.0004427343  ;;  %v94_v30 = vld [vmem:[%s294_s1] sm:$0xff]  ;;  %v95_v32 = vld [vmem:[%s294_s1 + $0x8] sm:$0xff]  ;;  %v160_v35 = vmul.f32 %v157_v27, %v157_v27 }
   0x8   :  { %v109_v18 = vmul.f32 %v108_v9, %v102_v2  ;;  %v118_v20 = vmul.f32 %v117_v12, %v103_v3  ;;  %223 = vpow2.f32 %v162_v15  ;;  %v159_v34 = vadd.f32 1.0, %v158_v8  ;;  %s225_s30 = scalar_lea.hbm %s297_s4, 16 }
   0x9   :  { %vm165_vm2 = vcmask 516096   ;;  %p226_p0 = scmp.ne.s32.totalorder %s297_s4, %s225_s30  ;;  %p229_p1 = scmp.lt.u32.totalorder %s225_s30, %s297_s4 }
   0xa   :  { %v161_v40 = vsub.f32 %v159_v34, %v160_v35 }
   0xb   :  { %p231_p2 = pnand %p229_p1, %p226_p0 }
   0xc   :  { %v216_v10 = vpop.eup %215 }
   0xd   :  { %v218_v13 = vpop.eup %217  ;;  %v97_v16 = vmul.f32 0.6931472, %v216_v10 }
   0xe   :  { %v99_v17 = vmul.f32 0.6931472, %v218_v13 }
   0xf   :  { %v100_v23 = vmax.f32 %v97_v16, -100.0 }
  0x10   :  { %v220_v19 = vpop.eup %219  ;;  %v101_v25 = vmax.f32 %v99_v17, -100.0 }
  0x11   :  { %v222_v21 = vpop.eup %221  ;;  %v106_v22 = vmul.f32 0.6931472, %v220_v19 }
  0x12   :  { %v115_v24 = vmul.f32 0.6931472, %v222_v21  ;;  %v224_v41 = vpop.eup %223 }
  0x13   :  { %v112_v26 = vsel %vm111_vm0, %v109_v18, %v106_v22  ;;  %v164_v45 = vsub.f32 %v161_v40, %v224_v41 }
  0x14   :  { %v121_v28 = vsel %vm120_vm1, %v118_v20, %v115_v24  ;;  %v122_v29 = vmax.f32 %v112_v26, -100.0 }
  0x15   :  { %v123_v31 = vmax.f32 %v121_v28, -100.0  ;;  %v166_v47 = vsel %vm165_vm2, %v164_v45, 0.0 }
  0x16   :  { %v124_v33 = vsub.f32 %v100_v23, %v122_v29 }
  0x17   :  { %v125_v36 = vsub.f32 %v101_v25, %v123_v31 }
  0x18   :  { %v126_v37 = vmul.f32 %v124_v33, %v94_v30 }
  0x19   :  { %v127_v38 = vmul.f32 %v125_v36, %v95_v32 }
  0x1a   :  { %v128_v39 = vadd.f32 %v126_v37, %v122_v29 }
  0x1b   :  { %v129_v42 = vadd.f32 %v127_v38, %v123_v31 }
  0x1c   :  { %v130_v43 = vsub.f32 0.0, %v128_v39 }
  0x1d   :  { %v131_v44 = vsub.f32 0.0, %v129_v42 }
  0x1f   :  { %v141_v46 = vadd.f32 %v131_v44, %v130_v43 }
  0x21   :  { %148 = vadd.xlane.f32.xlu0 %v141_v46 }
  0x25   :  { %167 = vadd.xlane.f32.xlu0 %v166_v47 }
  0xae   :  { %v149_v48 = vpop.xlane.xlu0 %148 }
  0xaf   :  { %v150_v49 = vrot.slane %v149_v48, 4 }
  0xb1   :  { %v151_v50 = vadd.f32 %v150_v49, %v149_v48 }
  0xb2   :  { %v168_v51 = vpop.xlane.xlu0 %167 }
  0xb3   :  { %v152_v52 = vrot.slane %v151_v50, 2  ;;  %v169_v53 = vrot.slane %v168_v51, 4 }
  0xb5   :  { %v170_v54 = vadd.f32 %v169_v53, %v168_v51  ;;  %v153_v55 = vadd.f32 %v152_v52, %v151_v50 }
  0xb7   :  { %v171_v56 = vrot.slane %v170_v54, 2  ;;  %v154_v57 = vrot.slane %v153_v55, 1 }
  0xb9   :  { %v172_v58 = vadd.f32 %v171_v56, %v170_v54  ;;  %v155_v59 = vadd.f32 %v154_v57, %v153_v55 }
  0xbb   :  { %210 = vpush %v155_v59  ;;  %v173_v60 = vrot.slane %v172_v58, 1 }
  0xbd   :  { %v174_v61 = vadd.f32 %v173_v60, %v172_v58 }
  0xbf   :  { %212 = vpush %v174_v61 }
  0xec   :  { %s211_s1 = spop %210 }
  0xf0   :  { %s213_s2 = spop %212 }
  0xf1   :  { %s178_s25 = smul.f32 0.015625, %s213_s2 }
  0xf3   :  { %s179_s26 = smul.f32 -0.5, %s178_s25 }
  0xf5   :  { %s182_s27 = sadd.f32 %s211_s1, %s179_s26 }
  0xf7   :  { %184 = sst [smem:[#allocation3]] %s182_s27 }
  0xf8   :  { %234 = shalt.err (!%p231_p2)
}
  0xf9   :  { %s237_s9 = smov [#allocation3]  }
  0xfa   :  { %192 = dma.smem_to_hbm %s237_s9, 16, %s297_s4, [#allocation4]  }
  0xfb   :  { %235 = dma.done.wait [#allocation4], 16  }
  0xfc   :  { %236 = vsyncadd [#allocation4], 4294967280 }
  0xfd   :  { %196 = sfence }
  0xfe   :  { %197 = vsyncpa [#allocation4], 1 }

</bundles_post_ra>
